<compile_context>
chip_gen: v7x
topology: tpu7x:2x2x1
jax: 0.10.0
libtpu: 0.0.40
codegen_flags: <defaults>
</compile_context>

<pallas_src>
import jax
import jax.numpy as jnp
from jax.experimental import pallas as pl
from jax.experimental.pallas import tpu as pltpu

_LANES = 128                       # vreg lane width
_TARGET_BLOCK_BYTES = 2 * 1024 * 1024  # 2 MiB/block; x4 (in+out, double-buffered) = 8 MiB


def _sublane_pack(dtype) -> int:
    """Minimum sublane multiple for the dtype: 8 (f32), 16 (bf16/f16), 32 (int8/fp8)."""
    return max(8, 32 // jnp.dtype(dtype).itemsize)


def _exp_activation_kernel(x_ref, o_ref):
    # exp(-x^2) * 5000 : VPU multiply -> EUP exp -> VPU scale.  f32 compute, cast on store.
    x = x_ref[...].astype(jnp.float32)
    o_ref[...] = (jnp.exp(-(x * x)) * 5000.0).astype(o_ref.dtype)


def exp_activation(x):
    """Elementwise exp(-x**2) * 5000 via a lane-dense, row-tiled Pallas kernel."""
    orig_shape = x.shape
    dtype = x.dtype
    total = x.size
    if total == 0:
        return x

    itemsize = jnp.dtype(dtype).itemsize
    sublane = _sublane_pack(dtype)
    tile_elems = sublane * _LANES

    # Minimal padding: only up to the (sublane, 128) tile boundary, never to a full block.
    padded_total = tile_elems * pl.cdiv(total, tile_elems)
    x_flat = jnp.ravel(x)                      # free bitcast for contiguous arrays
    if padded_total != total:
        x_flat = jnp.pad(x_flat, (0, padded_total - total))
    rows = padded_total // _LANES
    x2d = x_flat.reshape(rows, _LANES)

    # Block rows: ~2 MiB per block (bandwidth), rounded to the dtype's sublane pack,
    # and at least 2 blocks for medium/large inputs (v7x has 2 TensorCores).
    cap = max(sublane, (_TARGET_BLOCK_BYTES // (_LANES * itemsize)) // sublane * sublane)
    if rows > cap:
        block_rows = cap
    elif rows >= 4 * sublane:
        block_rows = sublane * pl.cdiv(pl.cdiv(rows, 2), sublane)
    else:
        block_rows = rows                      # single block == full array (always legal)

    grid = (pl.cdiv(rows, block_rows),)

    out2d = pl.pallas_call(
        _exp_activation_kernel,
        out_shape=jax.ShapeDtypeStruct((rows, _LANES), dtype),
        grid=grid,
        in_specs=[pl.BlockSpec((block_rows, _LANES), lambda i: (i, 0))],
        out_specs=pl.BlockSpec((block_rows, _LANES), lambda i: (i, 0)),
        compiler_params=pltpu.CompilerParams(
            dimension_semantics=("parallel",)),
        cost_estimate=pl.CostEstimate(
            flops=2 * padded_total,            # x*x and *5000
            transcendentals=padded_total,      # exp
            bytes_accessed=2 * padded_total * itemsize),
    )(x2d)

    out_flat = out2d.reshape(padded_total)
    if padded_total != total:
        out_flat = out_flat[:total]
    return out_flat.reshape(orig_shape)


def _reference(x):
    return jnp.exp(-jnp.square(x.astype(jnp.float32))) * 5000.0


if __name__ == "__main__":
    key = jax.random.PRNGKey(0)
    k1, k2, k3 = jax.random.split(key, 3)

    # 1) Small conv-style activation input (N, C, H, W) — aligned fast path, single block.
    x = jax.random.normal(k1, (2, 4, 16, 16), dtype=jnp.float32)
    out = jax.block_until_ready(exp_activation(x))
    ref = _reference(x)
    assert out.shape == x.shape
    assert jnp.allclose(out, ref, atol=1e-3, rtol=1e-5), \
        f"max err {jnp.max(jnp.abs(out - ref))}"

    # 2) Unaligned element count -> minimal pad + multi-block, non-divisible grid path.
    x2 = jax.random.normal(k2, (3, 5, 41, 7), dtype=jnp.float32)
    out2 = jax.block_until_ready(exp_activation(x2))
    ref2 = _reference(x2)
    assert out2.shape == x2.shape
    assert jnp.allclose(out2, ref2, atol=1e-3, rtol=1e-5), \
        f"max err {jnp.max(jnp.abs(out2 - ref2))}"

    # 3) bf16 input -> dtype-aware (16, 128) tiling, f32 compute inside the kernel.
    x3 = jax.random.normal(k3, (2, 4, 16, 16), dtype=jnp.bfloat16)
    out3 = jax.block_until_ready(exp_activation(x3))
    ref3 = _reference(x3).astype(jnp.bfloat16)
    assert out3.shape == x3.shape
    assert jnp.allclose(out3.astype(jnp.float32), ref3.astype(jnp.float32),
                        atol=50.0, rtol=2e-2)

    print("KERNEL_OK")
</pallas_src>

<mosaic_0001>
module attributes {stable_mosaic.version = 11 : i64} {
  func.func @_exp_activation_kernel(%arg0: i32, %arg1: memref<16x128xf32, #tpu.memory_space<vmem>>, %arg2: memref<16x128xf32, #tpu.memory_space<vmem>>) attributes {dimension_semantics = [#tpu.dimension_semantics<parallel>], iteration_bounds = array<i64: 1>, scalar_prefetch = 0 : i64, scratch_operands = 0 : i64, tpu.core_type = #tpu.core_type<tc>, window_params = [{transform_indices = @transform_0, window_bounds = array<i64: 16, 128>}, {transform_indices = @transform_1, window_bounds = array<i64: 16, 128>}]} {
    %c0 = arith.constant 0 : index
    %c0_0 = arith.constant 0 : index
    %0 = vector.load %arg1[%c0, %c0_0] : memref<16x128xf32, #tpu.memory_space<vmem>>, vector<16x128xf32>
    %1 = arith.mulf %0, %0 : vector<16x128xf32>
    %cst = arith.constant 0.000000e+00 : f32
    %2 = vector.broadcast %cst : f32 to vector<16x128xf32>
    %3 = arith.subf %2, %1 : vector<16x128xf32>
    %4 = math.exp %3 : vector<16x128xf32>
    %cst_1 = arith.constant 5.000000e+03 : f32
    %5 = vector.broadcast %cst_1 : f32 to vector<16x128xf32>
    %6 = arith.mulf %4, %5 : vector<16x128xf32>
    %c0_2 = arith.constant 0 : index
    %c0_3 = arith.constant 0 : index
    %7 = vector.load %arg2[%c0_2, %c0_3] : memref<16x128xf32, #tpu.memory_space<vmem>>, vector<16x128xf32>
    tpu.vector_store %arg2[%c0_2, %c0_3], %6 {strides = array<i32>} : memref<16x128xf32, #tpu.memory_space<vmem>>, vector<16x128xf32>,
    return
  }
  func.func @transform_0(%arg0: i32) -> (i32, i32) {
    %c0_i32 = arith.constant 0 : i32
    %c0_i32_0 = arith.constant 0 : i32
    return %arg0, %c0_i32 : i32, i32
  }
  func.func @transform_1(%arg0: i32) -> (i32, i32) {
    %c0_i32 = arith.constant 0 : i32
    %c0_i32_0 = arith.constant 0 : i32
    return %arg0, %c0_i32 : i32, i32
  }
}

</mosaic_0001>

<bundles_post_ra>
// kernel: tpu_custom_call.1
= control target key start
LH: loop header
LB: loop body
LE: loop exit
PB: predicated region body
PF: predicated region fallthrough
CT: control target
= control target key end

     0   :  { %6 = vsyncpa [#allocation3], 0  ;;  %s154_s0 = inlined_call_operand.hbm [shape: f32[16,128], index: 0, kind: input, shape index: {}]   ;;  %s155_s1 = inlined_call_operand.hbm [shape: f32[16,128], index: 1, kind: output, shape index: {}]  }
   0x1   :  { %7 = vsyncpa [#allocation4], 0  ;;  %s110_s6 = smov [#allocation2]   ;;  %s62_s10 = scalar_lea.hbm %s154_s0, 256 }
   0x2   :  { %s13_s7 = sshll.u32 %s110_s6, 4  ;;  %p63_p0 = scmp.ne.s32.totalorder %s154_s0, %s62_s10  ;;  %s14_s7 = int_to_ptr.vmem [resolvable:$true] %s13_s7 }
   0x3   :  { %p66_p1 = scmp.lt.u32.totalorder %s62_s10, %s154_s0 }
   0x5   :  { %p68_p2 = pnand %p66_p1, %p63_p0 }
   0x7   :  { %71 = shalt.err (!%p68_p2)
}
   0x8   :  { %s72_s15 = scalar_lea.vmem %s14_s7, 256  ;;  %p77_p4 = scmp.lt.s32.totalorder %s14_s7, %s14_s7 }
   0x9   :  { %p73_p3 = scmp.ne.s32.totalorder %s14_s7, %s72_s15  ;;  %p78_p5 = scmp.lt.s32.totalorder %s72_s15, %s72_s15 }
   0xb   :  { %p79_p6 = por %p78_p5, %p77_p4 }
   0xd   :  { %p80_p7 = pnand %p79_p6, %p73_p3 }
   0xf   :  { %83 = shalt.err (!%p80_p7)
}
  0x10   :  { %s111_s16 = smov 128   ;;  %s112_s17 = smov 8  }
  0x11   :  { %19 = dma.hbm_to_vmem [thread:$0]  %s154_s0, 256, %s14_s7, [#allocation3], %s111_s16, %s111_s16, %s112_s17  }
  0x12   :  { %106 = dma.done.wait [#allocation3], 256  }
  0x13   :  { %107 = vsyncadd [#allocation3], 4294967040  ;;  %v23_v0 = vld [vmem:[#allocation2] sm:$0xff]  ;;  %v24_v1 = vld [vmem:[#allocation2 + $0x8] sm:$0xff]  ;;  %s113_s20 = smov [#allocation5]  }
  0x14   :  { %v25_v2 = vmul.f32 %v23_v0, %v23_v0  ;;  %v26_v3 = vmul.f32 %v24_v1, %v24_v1  ;;  %s42_s21 = sshll.u32 %s113_s20, 4  ;;  %s43_s21 = int_to_ptr.vmem [resolvable:$true] %s42_s21 }
  0x15   :  { %s84_s0 = scalar_lea.vmem %s43_s21, 256  ;;  %p89_p9 = scmp.lt.s32.totalorder %s43_s21, %s43_s21 }
  0x16   :  { %v27_v4 = vsub.f32 0.0, %v25_v2  ;;  %v28_v5 = vsub.f32 0.0, %v26_v3  ;;  %p85_p8 = scmp.ne.s32.totalorder %s43_s21, %s84_s0  ;;  %p90_p10 = scmp.lt.s32.totalorder %s84_s0, %s84_s0 }
  0x18   :  { %v29_v6 = vmul.f32 1.442695, %v27_v4  ;;  %v31_v7 = vmul.f32 1.442695, %v28_v5  ;;  %p91_p11 = por %p90_p10, %p89_p9 }
  0x1a   :  { %58 = vpow2.f32 %v29_v6  ;;  %p92_p12 = pnand %p91_p11, %p85_p8 }
  0x1b   :  { %60 = vpow2.f32 %v31_v7 }
  0x24   :  { %v59_v8 = vpop.eup %58 }
  0x25   :  { %v61_v9 = vpop.eup %60  ;;  %v33_v10 = vmul.f32 5000.0, %v59_v8 }
  0x26   :  { %v34_v11 = vmul.f32 5000.0, %v61_v9 }
  0x27   :  { %35 = vst [vmem:[#allocation5] sm:$0xff] %v33_v10 }
  0x28   :  { %36 = vst [vmem:[#allocation5 + $0x8] sm:$0xff] %v34_v11 }
  0x29   :  { %95 = shalt.err (!%p92_p12)
}
  0x2a   :  { %s96_s24 = scalar_lea.hbm %s155_s1, 256 }
  0x2b   :  { %p97_p13 = scmp.ne.s32.totalorder %s155_s1, %s96_s24  ;;  %p100_p0 = scmp.lt.u32.totalorder %s96_s24, %s155_s1 }
  0x2d   :  { %p102_p1 = pnand %p100_p0, %p97_p13 }
  0x2f   :  { %105 = shalt.err (!%p102_p1)
}
  0x30   :  { %48 = dma.vmem_to_hbm [thread:$0]  %s43_s21, 256, %s155_s1, [#allocation4], %s111_s16, %s111_s16, %s112_s17  }
  0x31   :  { %108 = dma.done.wait [#allocation4], 256  }
  0x32   :  { %109 = vsyncadd [#allocation4], 4294967040 }
  0x33   :  { %52 = vsyncpa [#allocation3], 1 }
  0x34   :  { %53 = vsyncpa [#allocation4], 1 }

</bundles_post_ra>
